<compile_context>
chip_gen: v7x
topology: tpu7x:2x2x1
jax: 0.10.0
libtpu: 0.0.40
codegen_flags: <defaults>
</compile_context>

<pallas_src>
import functools

import jax
import jax.numpy as jnp
from jax.experimental import pallas as pl
from jax.experimental.pallas import tpu as pltpu


def _qnet_kernel(duel, action_size, compute_dtype,
                 x_ref, w1_ref, b1_ref, w2_ref, b2_ref, wh_ref, bh_ref,
                 out_ref):
    # Matmul inputs in `compute_dtype` (f32 default, bf16 optional for
    # v6e/v7x), accumulation always f32; bias add + ReLU stay in f32 so the
    # epilogue is exact on v5e as well.
    x = x_ref[...].astype(compute_dtype)

    h1 = jnp.dot(x, w1_ref[...].astype(compute_dtype),
                 preferred_element_type=jnp.float32)
    h1 = jnp.maximum(h1 + b1_ref[...], 0.0)

    h2 = jnp.dot(h1.astype(compute_dtype), w2_ref[...].astype(compute_dtype),
                 preferred_element_type=jnp.float32)
    h2 = jnp.maximum(h2 + b2_ref[...], 0.0)

    # Fused head: (B, A) when duel=0, (B, A+1) when duel=1.
    head = jnp.dot(h2.astype(compute_dtype), wh_ref[...].astype(compute_dtype),
                   preferred_element_type=jnp.float32) + bh_ref[...]
    if duel:
        # Split fused head and broadcast the state value over actions
        # (matches PyTorch (B,A) + (B,1)).
        q = head[:, :action_size] + head[:, action_size:action_size + 1]
    else:
        q = head
    out_ref[...] = q.astype(out_ref.dtype)


def qnetwork_forward(state, params, *, duel=0, tile_b=512,
                     compute_dtype=jnp.float32):
    """Full QNetwork forward pass inside one Pallas kernel.

    state: (B, state_size) float32
    params: dict with w1,b1,w2,b2,w3,b3,wv,bv; w* stored as (in, out).
    duel: 0 -> plain Q head, 1 -> dueling (Q + broadcast state value).
    tile_b: batch tile for the gridded path (multiple of 8; 512 keeps
            2-deep double buffering far below scoped VMEM even on v7x).
    compute_dtype: dtype of the matmul inputs (jnp.bfloat16 is a good choice
            on v6e/v7x; accumulation/bias/ReLU stay f32 regardless).
    """
    B, S = state.shape
    A = params["w3"].shape[1]
    f1 = params["w1"].shape[1]
    f2 = params["w2"].shape[1]

    # Fuse the dueling value head into the Q head outside the kernel: one MXU
    # pass instead of two (a (B,f2)x(f2,1) matmul wastes a whole pass).
    if duel:
        w_head = jnp.concatenate([params["w3"], params["wv"]], axis=1)
        b_head = jnp.concatenate([params["b3"], params["bv"]], axis=1)
    else:
        w_head = params["w3"]
        b_head = params["b3"]

    weights = (params["w1"], params["b1"], params["w2"], params["b2"],
               w_head, b_head)

    kernel = functools.partial(_qnet_kernel, duel, A, compute_dtype)

    head_out = w_head.shape[1]
    weight_bytes = sum(w.size * w.dtype.itemsize for w in weights)
    cost = pl.CostEstimate(
        flops=2 * B * (S * f1 + f1 * f2 + f2 * head_out),
        transcendentals=0,
        bytes_accessed=state.size * state.dtype.itemsize
        + weight_bytes + B * A * 4,
    )

    if B <= tile_b:
        # Toy / small batch: single whole-array block, no grid (avoids the
        # ~0.35us-per-step pipeline overhead). block_shape == full array dims
        # satisfies the (8,128) rule.  No loop-variable capture in the index
        # maps: every arg here is 2-D, so the map is the literal (0, 0).
        in_specs = ([pl.BlockSpec(state.shape, lambda: (0, 0))]
                    + [pl.BlockSpec(w.shape, lambda: (0, 0)) for w in weights])
        out_spec = pl.BlockSpec((B, A), lambda: (0, 0))
        return pl.pallas_call(
            kernel,
            out_shape=jax.ShapeDtypeStruct((B, A), jnp.float32),
            grid=(),
            in_specs=in_specs,
            out_specs=out_spec,
            cost_estimate=cost,
        )(state, *weights)

    # Production-scale batch: tile the batch axis.  Weights/biases use a
    # constant block index so they stay VMEM-resident across grid steps; the
    # batch axis is "parallel" so it shards across TensorCores (v7x megacore).
    n_tiles = pl.cdiv(B, tile_b)
    b_pad = n_tiles * tile_b
    state_in = state if b_pad == B else jnp.pad(state, ((0, b_pad - B), (0, 0)))

    in_specs = ([pl.BlockSpec((tile_b, S), lambda i: (i, 0))]
                + [pl.BlockSpec(w.shape, lambda i: (0, 0)) for w in weights])
    out_spec = pl.BlockSpec((tile_b, A), lambda i: (i, 0))

    out = pl.pallas_call(
        kernel,
        out_shape=jax.ShapeDtypeStruct((b_pad, A), jnp.float32),
        grid=(n_tiles,),
        in_specs=in_specs,
        out_specs=out_spec,
        compiler_params=pltpu.CompilerParams(
            dimension_semantics=("parallel",)),
        cost_estimate=cost,
    )(state_in, *weights)
    return out[:B]


def init_qnetwork_params(key, state_size, action_size, f1_unit=64, f2_unit=64):
    """Deterministic init mimicking torch.nn.Linear (U(-1/sqrt(fan_in), ...)).

    Weights are stored transposed, i.e. (in_features, out_features).
    """
    def linear(k, fan_in, fan_out):
        kw, kb = jax.random.split(k)
        bound = 1.0 / jnp.sqrt(fan_in)
        w = jax.random.uniform(kw, (fan_in, fan_out), jnp.float32, -bound, bound)
        b = jax.random.uniform(kb, (1, fan_out), jnp.float32, -bound, bound)
        return w, b

    k1, k2, k3, k4 = jax.random.split(key, 4)
    w1, b1 = linear(k1, state_size, f1_unit)
    w2, b2 = linear(k2, f1_unit, f2_unit)
    w3, b3 = linear(k3, f2_unit, action_size)
    wv, bv = linear(k4, f2_unit, 1)
    return dict(w1=w1, b1=b1, w2=w2, b2=b2, w3=w3, b3=b3, wv=wv, bv=bv)


def _reference_forward(state, p, duel):
    h1 = jnp.maximum(state @ p["w1"] + p["b1"], 0.0)
    h2 = jnp.maximum(h1 @ p["w2"] + p["b2"], 0.0)
    q = h2 @ p["w3"] + p["b3"]
    if duel:
        q = q + (h2 @ p["wv"] + p["bv"])
    return q


if __name__ == "__main__":
    key = jax.random.PRNGKey(0)
    k_param, k_state, k_big = jax.random.split(key, 3)

    state_size = 8
    action_size = 4
    f1_unit = 64
    f2_unit = 64

    params = init_qnetwork_params(k_param, state_size, action_size,
                                  f1_unit=f1_unit, f2_unit=f2_unit)

    # --- small batch: single-block path (grid=()) ---
    batch = 8
    state = jax.random.normal(k_state, (batch, state_size), jnp.float32)

    q_plain = jax.block_until_ready(qnetwork_forward(state, params, duel=0))
    q_duel = jax.block_until_ready(qnetwork_forward(state, params, duel=1))

    ref_plain = _reference_forward(state, params, 0)
    ref_duel = _reference_forward(state, params, 1)

    assert q_plain.shape == (batch, action_size)
    assert q_duel.shape == (batch, action_size)
    assert jnp.allclose(q_plain, ref_plain, atol=1e-5, rtol=1e-5)
    assert jnp.allclose(q_duel, ref_duel, atol=1e-5, rtol=1e-5)

    # --- larger batch: exercises the batch grid (parallel axis) with a
    #     non-divisible batch (40 rows, 16-row tiles -> padded to 48) ---
    big_batch = 40
    state_big = jax.random.normal(k_big, (big_batch, state_size), jnp.float32)
    q_big = jax.block_until_ready(
        qnetwork_forward(state_big, params, duel=1, tile_b=16))
    ref_big = _reference_forward(state_big, params, 1)
    assert q_big.shape == (big_batch, action_size)
    assert jnp.allclose(q_big, ref_big, atol=1e-5, rtol=1e-5)

    # Optional bf16-matmul path (v6e/v7x MXU fast path); looser tolerance.
    q_bf16 = jax.block_until_ready(
        qnetwork_forward(state_big, params, duel=1, tile_b=16,
                         compute_dtype=jnp.bfloat16))
    assert jnp.allclose(q_bf16, ref_big, atol=5e-2, rtol=5e-2)

    print("KERNEL_OK")
</pallas_src>

<mosaic_0001>
module attributes {stable_mosaic.version = 11 : i64} {
  func.func @_qnet_kernel(%arg0: memref<8x8xf32, #tpu.memory_space<vmem>>, %arg1: memref<8x64xf32, #tpu.memory_space<vmem>>, %arg2: memref<1x64xf32, #tpu.memory_space<vmem>>, %arg3: memref<64x64xf32, #tpu.memory_space<vmem>>, %arg4: memref<1x64xf32, #tpu.memory_space<vmem>>, %arg5: memref<64x4xf32, #tpu.memory_space<vmem>>, %arg6: memref<1x4xf32, #tpu.memory_space<vmem>>, %arg7: memref<8x4xf32, #tpu.memory_space<vmem>>) attributes {dimension_semantics = [], scalar_prefetch = 0 : i64, scratch_operands = 0 : i64, tpu.core_type = #tpu.core_type<tc>} {
    %c0 = arith.constant 0 : index
    %c0_0 = arith.constant 0 : index
    %0 = vector.load %arg0[%c0, %c0_0] : memref<8x8xf32, #tpu.memory_space<vmem>>, vector<8x8xf32>
    %c0_1 = arith.constant 0 : index
    %c0_2 = arith.constant 0 : index
    %1 = vector.load %arg1[%c0_1, %c0_2] : memref<8x64xf32, #tpu.memory_space<vmem>>, vector<8x64xf32>
    %cst = arith.constant dense<0.000000e+00> : vector<8x64xf32>
    %2 = tpu.matmul %0, %1, %cst {dimension_numbers = #tpu.dot_dimension_numbers<[1], [0], [0], [1], [0, 0, 1, 1], [], []>} : vector<8x8xf32>, vector<8x64xf32>, vector<8x64xf32> -> vector<8x64xf32>
    %c0_3 = arith.constant 0 : index
    %c0_4 = arith.constant 0 : index
    %3 = vector.load %arg2[%c0_3, %c0_4] : memref<1x64xf32, #tpu.memory_space<vmem>>, vector<1x64xf32>
    %4 = vector.broadcast %3 : vector<1x64xf32> to vector<8x64xf32>
    %5 = arith.addf %2, %4 : vector<8x64xf32>
    %cst_5 = arith.constant 0.000000e+00 : f32
    %6 = vector.broadcast %cst_5 : f32 to vector<8x64xf32>
    %7 = arith.maximumf %5, %6 : vector<8x64xf32>
    %c0_6 = arith.constant 0 : index
    %c0_7 = arith.constant 0 : index
    %8 = vector.load %arg3[%c0_6, %c0_7] : memref<64x64xf32, #tpu.memory_space<vmem>>, vector<64x64xf32>
    %cst_8 = arith.constant dense<0.000000e+00> : vector<8x64xf32>
    %9 = tpu.matmul %7, %8, %cst_8 {dimension_numbers = #tpu.dot_dimension_numbers<[1], [0], [0], [1], [0, 0, 1, 1], [], []>} : vector<8x64xf32>, vector<64x64xf32>, vector<8x64xf32> -> vector<8x64xf32>
    %c0_9 = arith.constant 0 : index
    %c0_10 = arith.constant 0 : index
    %10 = vector.load %arg4[%c0_9, %c0_10] : memref<1x64xf32, #tpu.memory_space<vmem>>, vector<1x64xf32>
    %11 = vector.broadcast %10 : vector<1x64xf32> to vector<8x64xf32>
    %12 = arith.addf %9, %11 : vector<8x64xf32>
    %cst_11 = arith.constant 0.000000e+00 : f32
    %13 = vector.broadcast %cst_11 : f32 to vector<8x64xf32>
    %14 = arith.maximumf %12, %13 : vector<8x64xf32>
    %c0_12 = arith.constant 0 : index
    %c0_13 = arith.constant 0 : index
    %15 = vector.load %arg5[%c0_12, %c0_13] : memref<64x4xf32, #tpu.memory_space<vmem>>, vector<64x4xf32>
    %cst_14 = arith.constant dense<0.000000e+00> : vector<8x4xf32>
    %16 = tpu.matmul %14, %15, %cst_14 {dimension_numbers = #tpu.dot_dimension_numbers<[1], [0], [0], [1], [0, 0, 1, 1], [], []>} : vector<8x64xf32>, vector<64x4xf32>, vector<8x4xf32> -> vector<8x4xf32>
    %c0_15 = arith.constant 0 : index
    %c0_16 = arith.constant 0 : index
    %17 = vector.load %arg6[%c0_15, %c0_16] : memref<1x4xf32, #tpu.memory_space<vmem>>, vector<1x4xf32>
    %18 = vector.broadcast %17 : vector<1x4xf32> to vector<8x4xf32>
    %19 = arith.addf %16, %18 : vector<8x4xf32>
    %c0_17 = arith.constant 0 : index
    %c0_18 = arith.constant 0 : index
    %20 = vector.load %arg7[%c0_17, %c0_18] : memref<8x4xf32, #tpu.memory_space<vmem>>, vector<8x4xf32>
    tpu.vector_store %arg7[%c0_17, %c0_18], %19 {strides = array<i32>} : memref<8x4xf32, #tpu.memory_space<vmem>>, vector<8x4xf32>,
    return
  }
}

</mosaic_0001>

<bundles_post_ra>
// kernel: tpu_custom_call.1
= control target key start
LH: loop header
LB: loop body
LE: loop exit
PB: predicated region body
PF: predicated region fallthrough
CT: control target
= control target key end

     0   :  { %12 = vsyncpa [#allocation3], 0  ;;  %s428_s24 = smov [#allocation2]   ;;  %s550_s0 = inlined_call_operand.vmem [shape: f32[8,8], index: 0, kind: input, shape index: {}]   ;;  %s551_s1 = inlined_call_operand.hbm [shape: f32[8,64], index: 1, kind: input, shape index: {}]   ;;  %s552_s2 = inlined_call_operand.vmem [shape: f32[1,64], index: 2, kind: input, shape index: {}]   ;;  %s553_s3 = inlined_call_operand.vmem [shape: f32[64,64], index: 3, kind: input, shape index: {}]   ;;  %s554_s4 = inlined_call_operand.vmem [shape: f32[1,64], index: 4, kind: input, shape index: {}]   ;;  %s555_s5 = inlined_call_operand.vmem [shape: f32[64,4], index: 5, kind: input, shape index: {}]   ;;  %s556_s6 = inlined_call_operand.vmem [shape: f32[1,4], index: 6, kind: input, shape index: {}]   ;;  %s557_s7 = inlined_call_operand.vmem [shape: f32[8,4], index: 7, kind: output, shape index: {}]  }
   0x1   :  { %s21_s25 = sshll.u32 %s428_s24, 4  ;;  %s404_s28 = scalar_lea.hbm %s551_s1, 128  ;;  %s22_s25 = int_to_ptr.vmem [resolvable:$true] %s21_s25 }
   0x2   :  { %p405_p0 = scmp.ne.s32.totalorder %s551_s1, %s404_s28  ;;  %p408_p1 = scmp.lt.u32.totalorder %s404_s28, %s551_s1 }
   0x4   :  { %p410_p2 = pnand %p408_p1, %p405_p0 }
   0x6   :  { %413 = shalt.err (!%p410_p2)
}
   0x7   :  { %s414_s10 = scalar_lea.vmem %s22_s25, 128  ;;  %p419_p4 = scmp.lt.s32.totalorder %s22_s25, %s22_s25 }
   0x8   :  { %p415_p3 = scmp.ne.s32.totalorder %s22_s25, %s414_s10  ;;  %p420_p5 = scmp.lt.s32.totalorder %s414_s10, %s414_s10 }
   0xa   :  { %p421_p6 = por %p420_p5, %p419_p4 }
   0xc   :  { %p422_p7 = pnand %p421_p6, %p415_p3 }
   0xe   :  { %425 = shalt.err (!%p422_p7)
}
   0xf   :  { %24 = dma.hbm_to_vmem [thread:$0]  %s551_s1, 128, %s22_s25, [#allocation3]  }
  0x10   :  { %426 = dma.done.wait [#allocation3], 128  }
  0x11   :  { %427 = vsyncadd [#allocation3], 4294967168  ;;  %v429_v0 = vmov 0.0   ;;  %vm430_vm0 = vmmov 0   ;;  %v431_v1 = vmov 0.0|0.0   ;;  %vm47_vm1 = vcmask 64512  }
  0x12   :  { %333 = vmatprep.subr.mxu0 %v429_v0  ;;  %335 = vmatprep.mubr.msk.f32.mxu0 %vm430_vm0, %v429_v0  ;;  %v39_v2 = vld [vmem:[#allocation2] sm:$0xff]  ;;  %v123_v5 = vld [vmem:[%s553_s3 + $0x8] sm:$0xff]  ;;  %v124_v6 = vld [vmem:[%s553_s3 + $0x10] sm:$0xff]  ;;  %vm137_vm2 = vcmask 523264   ;;  %vm300_vm3 = vcmask 31744  }
  0x13   :  { %376 = vmatprep.subr.bf16.mxu1 %v431_v1  ;;  %354 = vmatprep.mubr.msk.f32.mxu1 %vm430_vm0, %v429_v0  ;;  %v38_v3 = vld [vmem:[%s550_s0] sm:$0xff]  ;;  %v125_v7 = vld [vmem:[%s553_s3 + $0x18] sm:$0xff]  ;;  %v127_v11 = vld [vmem:[%s553_s3 + $0x28] sm:$0xff] }
  0x14   :  { %v122_v4 = vld [vmem:[%s553_s3] sm:$0xff]  ;;  %334 = vmatpush3.msra.mxu0 %v39_v2  ;;  %v380_v9 = vpack.c.bf16 %v125_v7, %v124_v6  ;;  %v128_v13 = vld [vmem:[%s553_s3 + $0x30] sm:$0xff]  ;;  %v129_v14 = vld [vmem:[%s553_s3 + $0x38] sm:$0xff] }
  0x15   :  { %336 = vmatmul.mubr.msk.f32.vlgmr.msra.gmra.mrb[0].mxu0 %vm47_vm1, %v38_v3  ;;  %v377_v8 = vpack.c.bf16 %v123_v5, %v122_v4  ;;  %388 = vmatprep.subr.bf16.mxu0 %v431_v1  ;;  %v126_v10 = vld [vmem:[%s553_s3 + $0x20] sm:$0xff]  ;;  %v386_v15 = vpack.c.bf16 %v129_v14, %v128_v13  ;;  %v213_v17 = vld [vmem:[%s555_s5 + $0x8] sm:$0xff]  ;;  %v214_v18 = vld [vmem:[%s555_s5 + $0x10] sm:$0xff] }
  0x16   :  { %373 = vmatprep.mubr.msk.f32.mxu0 %vm430_vm0, %v429_v0  ;;  %v383_v12 = vpack.c.bf16 %v127_v11, %v126_v10  ;;  %v212_v16 = vld [vmem:[%s555_s5] sm:$0xff]  ;;  %v215_v20 = vld [vmem:[%s555_s5 + $0x18] sm:$0xff]  ;;  %v217_v23 = vld [vmem:[%s555_s5 + $0x28] sm:$0xff] }
  0x17   :  { %378 = vmatpush3.bf16.msra.mxu1 %v377_v8  ;;  %v389_v19 = vpack.c.bf16 %v213_v17, %v212_v16  ;;  %v392_v21 = vpack.c.bf16 %v215_v20, %v214_v18  ;;  %v216_v22 = vld [vmem:[%s555_s5 + $0x20] sm:$0xff]  ;;  %v218_v30 = vld [vmem:[%s555_s5 + $0x30] sm:$0xff]  ;;  %v219_v31 = vld [vmem:[%s555_s5 + $0x38] sm:$0xff] }
  0x18   :  { %379 = vmatprep.subr.bf16.mxu1 %v431_v1  ;;  %v395_v24 = vpack.c.bf16 %v217_v23, %v216_v22  ;;  %v307_v25 = vld [vmem:[%s552_s2] ss:$0 sm:$0xff]  ;;  %v398_v32 = vpack.c.bf16 %v219_v31, %v218_v30 }
  0x19   :  { %390 = vmatpush3.bf16.msra.mxu0 %v389_v19  ;;  %v309_v33 = vld [vmem:[%s554_s4] ss:$0 sm:$0xff] }
  0x1a   :  { %391 = vmatprep.subr.bf16.mxu0 %v431_v1  ;;  %v311_v38 = vld [vmem:[%s556_s6] ss:$0 sm:$0xff] }
  0x1b   :  { %381 = vmatpush3.bf16.msra.mxu1 %v380_v9 }
  0x1c   :  { %382 = vmatprep.subr.bf16.mxu1 %v431_v1 }
  0x1d   :  { %393 = vmatpush3.bf16.msra.mxu0 %v392_v21 }
  0x1e   :  { %394 = vmatprep.subr.bf16.mxu0 %v431_v1 }
  0x1f   :  { %384 = vmatpush3.bf16.msra.mxu1 %v383_v12 }
  0x20   :  { %385 = vmatprep.subr.bf16.mxu1 %v431_v1 }
  0x21   :  { %396 = vmatpush3.bf16.msra.mxu0 %v395_v24 }
  0x22   :  { %397 = vmatprep.subr.bf16.mxu0 %v431_v1 }
  0x23   :  { %387 = vmatpush3.bf16.msra.mxu1 %v386_v15 }
  0x25   :  { %399 = vmatpush3.bf16.msra.mxu0 %v398_v32 }
  0xe8   :  { %v117_v26 = vpop.f32.mrb[0].mxu0 }
  0xe9   :  { %v118_v27 = vadd.f32 %v307_v25, %v117_v26  ;;  %v337_v28 = vpop.f32.mrb[1].mxu0 }
  0xeb   :  { %v121_v29 = vmax.f32 %v118_v27, 0.0 }
  0xed   :  { %355 = vmatmul.mubr.msk.f32.vlgmr.msra.gmra.mrb[0].mxu1 %vm137_vm2, %v121_v29 }
 0x1c0   :  { %v207_v34 = vpop.f32.mrb[0].mxu1 }
 0x1c1   :  { %v208_v35 = vadd.f32 %v309_v33, %v207_v34  ;;  %v356_v36 = vpop.f32.mrb[1].mxu1 }
 0x1c3   :  { %v211_v37 = vmax.f32 %v208_v35, 0.0 }
 0x1c5   :  { %374 = vmatmul.mubr.msk.f32.vlgmr.msra.gmra.mrb[2].mxu0 %vm137_vm2, %v211_v37 }
 0x298   :  { %v296_v39 = vpop.f32.mrb[2].mxu0 }
 0x299   :  { %v297_v40 = vadd.f32 %v311_v38, %v296_v39  ;;  %v375_v41 = vpop.f32.mrb[3].mxu0 }
 0x29b   :  { %301 = vst.msk [vmem:[%s557_s7] sm:$0xff] %vm300_vm3, %v297_v40 }
 0x29c   :  { %306 = vsyncpa [#allocation3], 1 }

</bundles_post_ra>
